<compile_context>
chip_gen: v6e
topology: v6e:2x2x1
jax: 0.10.0
libtpu: 0.0.40
codegen_flags: <defaults>
</compile_context>

<pallas_src>
import functools

import jax
import jax.numpy as jnp
import numpy as np
from jax.experimental import pallas as pl
from jax.experimental.pallas import tpu as pltpu

_VMEM_LIMIT = 48 * 1024 * 1024         # scoped-VMEM cap; below v7x's 64 MiB physical
_RED_VMEM_BUDGET = 20 * 1024 * 1024    # data bytes resident per reduction grid step
_SMALL_FALLBACK_ELEMS = 1 << 18        # below this, fused XLA isfinite().all() wins
_PALLAS_DTYPES = tuple(jnp.dtype(t) for t in (jnp.float32, jnp.bfloat16, jnp.float16))


# ----------------------------------------------------------------------------
# Forward: IgnoreGradManipulations.forward == self.module.forward(...) -> pass-through.
# ----------------------------------------------------------------------------
def _identity_copy_kernel(x_ref, o_ref):
    o_ref[...] = x_ref[...]


def _debug_identity_copy(x: jax.Array) -> jax.Array:
    """Debug-only tiled identity copy through VMEM (exercises the Pallas plumbing)."""
    if x.size == 0 or x.size % 128 != 0:
        # TODO(synk): debug copy only handles 128-divisible sizes; the production forward
        # is the literal pass-through below anyway.
        return x
    rows = x.size // 128
    block_rows = rows
    for cand in (4096, 2048, 1024, 512, 256, 128, 64, 32, 16, 8):
        if rows % cand == 0:
            block_rows = cand
            break
    slab = x.reshape(rows, 128)                       # contiguous reshape: free
    out = pl.pallas_call(
        _identity_copy_kernel,
        out_shape=jax.ShapeDtypeStruct((rows, 128), x.dtype),
        grid=(rows // block_rows,),
        in_specs=[pl.BlockSpec((block_rows, 128), lambda i: (i, 0))],
        out_specs=pl.BlockSpec((block_rows, 128), lambda i: (i, 0)),
        compiler_params=pltpu.CompilerParams(
            dimension_semantics=("parallel",),
            vmem_limit_bytes=_VMEM_LIMIT,
        ),
    )(slab)
    return out.reshape(x.shape)


def ignore_grad_manipulations_forward(x: jax.Array, *, debug_identity_kernel: bool = False):
    """forward(*args, **kwargs): pure delegation to the wrapped module.

    The wrapper owns no parameters and adds no compute, so the fastest correct
    implementation is literally returning the wrapped module's output (zero HBM traffic,
    no defensive copies).  `debug_identity_kernel=True` routes the tensor through a tiled
    Pallas copy purely for plumbing/debug purposes.
    """
    if debug_identity_kernel:
        return _debug_identity_copy(x)
    return x


# ----------------------------------------------------------------------------
# zero_grad() finiteness check: all(isfinite(grad)) as a tiled Pallas AND-reduction.
# ----------------------------------------------------------------------------
def _isfinite_all_kernel(g_ref, o_ref, acc_ref, *, rows, block_rows, nb, nbh):
    i = pl.program_id(1)
    blk = pl.program_id(0) * nbh + i          # unclamped row-block id handled by this step

    @pl.when(i == 0)
    def _init():
        acc_ref[0] = jnp.int32(1)

    # Interior (full) blocks: plain elementwise isfinite + AND-reduce.
    @pl.when(blk < nb - 1)
    def _full_block():
        x = g_ref[...].astype(jnp.float32)    # in-register widen: robust on v5e (no bf16 VPU)
        acc_ref[0] = acc_ref[0] & jnp.all(jnp.isfinite(x)).astype(jnp.int32)

    # Last block: may be a partial edge block.  Rows past `rows` hold stale VMEM (Pallas
    # does not zero-fill edge blocks) and must be masked out of the AND.
    @pl.when(blk == nb - 1)
    def _tail_block():
        x = g_ref[...].astype(jnp.float32)
        row_ids = blk * block_rows + jax.lax.broadcasted_iota(jnp.int32, x.shape, 0)
        ok = jnp.isfinite(x) | (row_ids >= rows)
        acc_ref[0] = acc_ref[0] & jnp.all(ok).astype(jnp.int32)

    # blk >= nb happens only when the 2-way core split overshoots an odd block count;
    # the index_map clamps the (harmless) DMA and the compute is simply skipped.

    @pl.when(i == pl.num_programs(1) - 1)
    def _finalize():
        o_ref[...] = jnp.full(o_ref.shape, acc_ref[0], dtype=jnp.int32)


def grad_isfinite_all(g: jax.Array, *,
                      min_pallas_elems: int = _SMALL_FALLBACK_ELEMS,
                      vmem_budget_bytes: int = _RED_VMEM_BUDGET) -> jax.Array:
    """zero_grad() bypass check: int32 scalar, 1 iff every gradient element is finite."""
    if g.size == 0 or not jnp.issubdtype(g.dtype, jnp.floating):
        return jnp.int32(1)
    if g.dtype not in _PALLAS_DTYPES or g.size < max(min_pallas_elems, 1):
        # Biases / norm scales / exotic dtypes: a fused XLA reduction is already at the
        # HBM roofline and avoids a per-parameter pallas_call launch.
        return jnp.isfinite(g).all().astype(jnp.int32)

    total = g.size
    lanes = next((l for l in (512, 256, 128) if total % l == 0), None)
    rows = total // lanes if lanes is not None else 0
    if lanes is None or rows < 8:
        # TODO(synk): lane-ragged (size % 128 != 0) grads keep the fused XLA path rather
        # than paying a full pad/copy just to present a rectangular slab to Pallas.
        return jnp.isfinite(g).all().astype(jnp.int32)

    itemsize = jnp.dtype(g.dtype).itemsize
    widen = 0 if itemsize >= 4 else 4                     # f32 widen temp for bf16/f16
    per_elem = 2 * itemsize + widen + 2                   # 2x input (double buffer) + temps
    block_rows = max(8, (vmem_budget_bytes // (per_elem * lanes)) // 8 * 8)
    block_rows = min(block_rows, rows // 8 * 8)
    nb = -(-rows // block_rows)                           # number of row blocks
    split = 2 if nb >= 2 else 1                           # v7x: one half per TensorCore
    nbh = -(-nb // split)

    kernel = functools.partial(
        _isfinite_all_kernel, rows=rows, block_rows=block_rows, nb=nb, nbh=nbh)

    partial_ok = pl.pallas_call(
        kernel,
        out_shape=jax.ShapeDtypeStruct((split, 8, 128), jnp.int32),
        grid=(split, nbh),
        in_specs=[pl.BlockSpec(
            (block_rows, lanes),
            lambda c, i: (jnp.minimum(c * nbh + i, nb - 1), 0))],
        out_specs=pl.BlockSpec((1, 8, 128), lambda c, i: (c, 0, 0)),
        scratch_shapes=[pltpu.SMEM((1,), jnp.int32)],
        compiler_params=pltpu.CompilerParams(
            dimension_semantics=("parallel", "arbitrary"),
            vmem_limit_bytes=_VMEM_LIMIT,
        ),
    )(g.reshape(rows, lanes))                             # contiguous reshape: free, no pad

    return jnp.min(partial_ok[:, 0, 0]).astype(jnp.int32)


def grads_all_finite(grads) -> jax.Array:
    """`all(param.grad.isfinite().all() for param in self.parameters())` -> int32 scalar."""
    ok = jnp.int32(1)
    for g in grads:
        ok = ok & grad_isfinite_all(g)
    return ok


# TODO(synk): zero_grad(set_to_none=...) bypass and clip_grad_norm_(max_norm, norm_type)
# bypass are optimizer-side Python control flow with no forward-pass Pallas equivalent;
# only the isfinite-all gradient check (the class's sole numeric compute) is kernelized.


if __name__ == "__main__":
    key = jax.random.PRNGKey(0)
    k_x, k_g1, k_g2, k_g3, k_g4 = jax.random.split(key, 5)

    # ---- forward: exact pass-through of the wrapped module's output --------------------
    x = jax.random.normal(k_x, (2, 4, 16, 16), dtype=jnp.float32)
    y = ignore_grad_manipulations_forward(x)
    assert y is x, "production forward must be a literal pass-through"
    y_dbg = jax.block_until_ready(
        ignore_grad_manipulations_forward(x, debug_identity_kernel=True))
    assert y_dbg.shape == x.shape and y_dbg.dtype == x.dtype
    assert np.array_equal(np.asarray(y_dbg), np.asarray(x))

    # ---- zero_grad() finiteness check ---------------------------------------------------
    # Small grad (bias-like): fused XLA fallback path.
    g_small = jax.random.normal(k_g1, (2, 4, 16, 16), dtype=jnp.float32)
    assert int(jax.block_until_ready(grad_isfinite_all(g_small))) == 1
    assert int(jax.block_until_ready(
        grad_isfinite_all(g_small.at[0, 0, 0, 0].set(jnp.inf)))) == 0

    # f32 grad above the threshold: Pallas streaming path (default block sizing).
    g_f32 = jax.random.normal(k_g2, (512, 1024), dtype=jnp.float32)
    assert int(jax.block_until_ready(grad_isfinite_all(g_f32))) == 1
    assert int(jax.block_until_ready(
        grad_isfinite_all(g_f32.at[511, 1023].set(jnp.nan)))) == 0

    # Multi-block + 2-way TensorCore split + clamped overshoot block, forced small blocks.
    g_mb = jax.random.normal(k_g3, (1000, 512), dtype=jnp.float32)
    assert int(jax.block_until_ready(
        grad_isfinite_all(g_mb, min_pallas_elems=0, vmem_budget_bytes=1 << 20))) == 1
    assert int(jax.block_until_ready(
        grad_isfinite_all(g_mb.at[999, 511].set(-jnp.inf),
                          min_pallas_elems=0, vmem_budget_bytes=1 << 20))) == 0

    # bf16 grad with a ragged row count: native-dtype stream + masked partial tail block.
    g_bf16 = jax.random.normal(k_g4, (750, 512), dtype=jnp.float32).astype(jnp.bfloat16)
    assert int(jax.block_until_ready(
        grad_isfinite_all(g_bf16, min_pallas_elems=0, vmem_budget_bytes=1 << 20))) == 1
    assert int(jax.block_until_ready(
        grad_isfinite_all(g_bf16.at[749, 0].set(jnp.inf),
                          min_pallas_elems=0, vmem_budget_bytes=1 << 20))) == 0

    # Non-float grads pass trivially; whole-parameter-list AND matches zero_grad() logic.
    assert int(grad_isfinite_all(jnp.arange(10, dtype=jnp.int32))) == 1
    assert int(jax.block_until_ready(grads_all_finite([g_small, g_f32, g_bf16]))) == 1

    print("KERNEL_OK")
</pallas_src>

<mosaic_0001>
module attributes {stable_mosaic.version = 11 : i64} {
  func.func @_identity_copy_kernel(%arg0: i32, %arg1: memref<16x128xf32, #tpu.memory_space<vmem>>, %arg2: memref<16x128xf32, #tpu.memory_space<vmem>>) attributes {dimension_semantics = [#tpu.dimension_semantics<parallel>], iteration_bounds = array<i64: 1>, scalar_prefetch = 0 : i64, scratch_operands = 0 : i64, tpu.core_type = #tpu.core_type<tc>, window_params = [{transform_indices = @transform_0, window_bounds = array<i64: 16, 128>}, {transform_indices = @transform_1, window_bounds = array<i64: 16, 128>}]} {
    %c0 = arith.constant 0 : index
    %c0_0 = arith.constant 0 : index
    %0 = vector.load %arg1[%c0, %c0_0] : memref<16x128xf32, #tpu.memory_space<vmem>>, vector<16x128xf32>
    %c0_1 = arith.constant 0 : index
    %c0_2 = arith.constant 0 : index
    %1 = vector.load %arg2[%c0_1, %c0_2] : memref<16x128xf32, #tpu.memory_space<vmem>>, vector<16x128xf32>
    tpu.vector_store %arg2[%c0_1, %c0_2], %0 {strides = array<i32>} : memref<16x128xf32, #tpu.memory_space<vmem>>, vector<16x128xf32>,
    return
  }
  func.func @transform_0(%arg0: i32) -> (i32, i32) {
    %c0_i32 = arith.constant 0 : i32
    %c0_i32_0 = arith.constant 0 : i32
    return %arg0, %c0_i32 : i32, i32
  }
  func.func @transform_1(%arg0: i32) -> (i32, i32) {
    %c0_i32 = arith.constant 0 : i32
    %c0_i32_0 = arith.constant 0 : i32
    return %arg0, %c0_i32 : i32, i32
  }
}

</mosaic_0001>

<bundles_post_ra>
// kernel: tpu_custom_call.1
= control target key start
LH: loop header
LB: loop body
LE: loop exit
PB: predicated region body
PF: predicated region fallthrough
CT: control target
= control target key end

     0   :  { %6 = vsyncpa [#allocation3], 0  ;;  %s112_s0 = inlined_call_operand.hbm [shape: f32[16,128], index: 0, kind: input, shape index: {}]   ;;  %s113_s1 = inlined_call_operand.hbm [shape: f32[16,128], index: 1, kind: output, shape index: {}]  }
   0x1   :  { %7 = vsyncpa [#allocation4], 0  ;;  %s92_s6 = smov [#allocation2]  }
   0x2   :  { %s13_s7 = sshll.u32 %s92_s6, 4  ;;  %s14_s7 = int_to_ptr.vmem [resolvable:$true] %s13_s7 }
   0x3   :  { %s56_s8 = scalar_lea.vmem %s14_s7, 256  ;;  %p61_p1 = scmp.lt.s32.totalorder %s14_s7, %s14_s7 }
   0x4   :  { %p57_p0 = scmp.ne.s32.totalorder %s14_s7, %s56_s8  ;;  %p62_p2 = scmp.lt.s32.totalorder %s56_s8, %s56_s8 }
   0x6   :  { %p63_p3 = por %p62_p2, %p61_p1 }
   0x8   :  { %p64_p4 = pnand %p63_p3, %p57_p0 }
   0xa   :  { %67 = shalt.err (!%p64_p4)
}
   0xb   :  { %s93_s9 = smov 128   ;;  %s94_s10 = smov 8  }
   0xc   :  { %19 = dma.hbm_to_vmem [thread:$0]  %s112_s0, 256, %s14_s7, [#allocation3], %s93_s9, %s93_s9, %s94_s10  }
   0xd   :  { %88 = dma.done.wait [#allocation3], 256  }
   0xe   :  { %89 = vsyncadd [#allocation3], 4294967040  ;;  %s95_s13 = smov [#allocation5]   ;;  %v23_v0 = vld [vmem:[#allocation2] sm:$0xff]  ;;  %v24_v1 = vld [vmem:[#allocation2 + $0x8] sm:$0xff] }
   0xf   :  { %s32_s14 = sshll.u32 %s95_s13, 4  ;;  %25 = vst [vmem:[#allocation5] sm:$0xff] %v23_v0  ;;  %26 = vst [vmem:[#allocation5 + $0x8] sm:$0xff] %v24_v1  ;;  %s33_s14 = int_to_ptr.vmem [resolvable:$true] %s32_s14 }
  0x10   :  { %s68_s15 = scalar_lea.vmem %s33_s14, 256  ;;  %p73_p6 = scmp.lt.s32.totalorder %s33_s14, %s33_s14 }
  0x11   :  { %p69_p5 = scmp.ne.s32.totalorder %s33_s14, %s68_s15  ;;  %p74_p7 = scmp.lt.s32.totalorder %s68_s15, %s68_s15 }
  0x13   :  { %p75_p8 = por %p74_p7, %p73_p6 }
  0x15   :  { %p76_p9 = pnand %p75_p8, %p69_p5 }
  0x17   :  { %79 = shalt.err (!%p76_p9)
}
  0x18   :  { %38 = dma.vmem_to_hbm [thread:$0]  %s33_s14, 256, %s113_s1, [#allocation4], %s93_s9, %s93_s9, %s94_s10  }
  0x19   :  { %90 = dma.done.wait [#allocation4], 256  }
  0x1a   :  { %91 = vsyncadd [#allocation4], 4294967040 }
  0x1b   :  { %42 = vsyncpa [#allocation3], 1 }
  0x1c   :  { %43 = vsyncpa [#allocation4], 1 }

</bundles_post_ra>
